<compile_context>
chip_gen: v5e
topology: v5e:2x2
jax: 0.10.0
libtpu: 0.0.40
codegen_flags: <defaults>
</compile_context>

<pallas_src>
import functools

import jax
import jax.numpy as jnp
from jax.experimental import pallas as pl
from jax.experimental.pallas import tpu as pltpu


def _layer_norm(y, gamma, beta, eps=1e-5):
    mu = jnp.mean(y, axis=-1, keepdims=True)
    var = jnp.mean(jnp.square(y - mu), axis=-1, keepdims=True)
    return (y - mu) * jax.lax.rsqrt(var + eps) * gamma + beta


# --------------------------------------------------------------------------------------
# Pallas kernel: full encoder-block stack for one batch tile.
#   grid = (batch_tiles, num_blocks); the activation carry lives in acc_ref (VMEM).
#   Packed f32 vector slab rows: 0=bqkv, 1=bf1, 2=bo, 3=g1, 4=be1, 5=bf2, 6=g2, 7=be2.
# --------------------------------------------------------------------------------------
def encoder_stack_kernel(
    x_ref, wqkvo_ref, w1_ref, w2_ref, vec_ref,      # inputs
    o_ref,                                          # output
    acc_ref,                                        # VMEM activation carry
    *, num_heads: int, resident: bool,
):
    l = pl.program_id(1)
    n_blocks = pl.num_programs(1)
    blk = l if resident else 0                      # resident: index whole-stack slab

    bt, S, D = x_ref.shape                          # static block shape
    F = w1_ref.shape[-1]
    H = num_heads
    Dh = D // H
    R = bt * S
    scale = 1.0 / (float(Dh) ** 0.5)

    # Seed the activation carry on the first encoder block of this batch tile.
    @pl.when(l == 0)
    def _():
        acc_ref[...] = x_ref[...].reshape(R, D)

    x = acc_ref[...]                                # (R, D) float32 carry
    xb = x.astype(jnp.bfloat16)

    wqkvo = wqkvo_ref[blk]                          # (D, 4D) bf16: [Wq | Wk | Wv | Wo]
    w1 = w1_ref[blk]                                # (D, F)  bf16
    w2 = w2_ref[blk]                                # (F, D)  bf16
    vecs = vec_ref[blk]                             # (8, P)  f32 packed vector params

    bqkv = vecs[0:1, :3 * D]                        # (1, 3D)
    bf1 = vecs[1:2, :F]                             # (1, F)
    bo = vecs[2:3, :D]
    g1 = vecs[3:4, :D]
    be1 = vecs[4:5, :D]
    bf2 = vecs[5:6, :D]
    g2 = vecs[6:7, :D]
    be2 = vecs[7:8, :D]

    # ---- fused Q/K/V projection: one (R, D) x (D, 3D) MXU matmul ---------------------
    qkv = jnp.dot(xb, wqkvo[:, : 3 * D],
                  preferred_element_type=jnp.float32) + bqkv          # (R, 3D) f32

    # ---- scaled-dot-product attention core (per head: tiny (S,S) softmax) ------------
    ctx_heads = []
    for h in range(H):                              # static unroll; H is small
        qh = qkv[:, h * Dh:(h + 1) * Dh].reshape(bt, S, Dh).astype(jnp.bfloat16)
        kh = qkv[:, D + h * Dh:D + (h + 1) * Dh].reshape(bt, S, Dh).astype(jnp.bfloat16)
        vh = qkv[:, 2 * D + h * Dh:2 * D + (h + 1) * Dh].reshape(bt, S, Dh).astype(jnp.bfloat16)

        s = jnp.einsum("bqd,bkd->bqk", qh, kh,
                       preferred_element_type=jnp.float32) * scale    # (bt, S, S)
        s = s - jnp.max(s, axis=-1, keepdims=True)
        p = jnp.exp(s)
        p = p * pl.reciprocal(jnp.sum(p, axis=-1, keepdims=True), approx=True)

        ctx = jnp.einsum("bqk,bkd->bqd", p.astype(jnp.bfloat16), vh,
                         preferred_element_type=jnp.float32)          # (bt, S, Dh)
        ctx_heads.append(ctx.reshape(R, Dh))

    # heads concatenated along lanes -> single output projection matmul
    ctx_all = jnp.concatenate(ctx_heads, axis=-1).astype(jnp.bfloat16)   # (R, D)
    attn = jnp.dot(ctx_all, wqkvo[:, 3 * D:],
                   preferred_element_type=jnp.float32) + bo

    # ---- LayerNorm1 + residual -------------------------------------------------------
    x1 = _layer_norm(attn, g1, be1) + x

    # ---- feed-forward network --------------------------------------------------------
    hdn = jnp.dot(x1.astype(jnp.bfloat16), w1,
                  preferred_element_type=jnp.float32) + bf1
    hdn = jnp.maximum(hdn, 0.0)
    ff = jnp.dot(hdn.astype(jnp.bfloat16), w2,
                 preferred_element_type=jnp.float32) + bf2

    # ---- LayerNorm2 + residual -------------------------------------------------------
    x2 = _layer_norm(ff, g2, be2) + x1

    # Carry write is skipped on the last block (output is written instead).
    @pl.when(l < n_blocks - 1)
    def _():
        acc_ref[...] = x2

    @pl.when(l == n_blocks - 1)
    def _():
        o_ref[...] = x2.reshape(bt, S, D).astype(o_ref.dtype)


# --------------------------------------------------------------------------------------
# Tiling / VMEM heuristics
# --------------------------------------------------------------------------------------
def _pick_batch_tile(B, S, target_rows=512, min_grid=2):
    """Largest divisor of B with bt*S <= target_rows AND >= min_grid parallel steps."""
    best = 1
    for cand in range(1, B + 1):
        if B % cand != 0:
            continue
        if cand * S > max(target_rows, S):
            continue
        if (B // cand) < min(min_grid, B):
            continue            # keep >= 2 steps on the "parallel" axis (v7x 2 TCs)
        best = cand
    return best


def _pick_vmem_limit(needed_bytes):
    """Size the VMEM limit from the real working set, capped per chip generation."""
    try:
        kind = jax.devices()[0].device_kind.lower()
    except Exception:
        kind = ""
    # v5e/v6e have 128 MiB physical VMEM; v7x only 64 MiB -> stay conservative there.
    cap = (112 << 20) if ("v5" in kind or "v6" in kind) else (56 << 20)
    return int(min(max(2 * needed_bytes, 32 << 20), cap))


def encoder_stack_pallas(x, stacked, num_heads, *, batch_tile=None):
    """x: (B, S, D) float32. stacked: dict of consolidated slabs (see stack_block_params)."""
    B, S, D = x.shape
    L = stacked["wqkvo"].shape[0]
    F = stacked["w1"].shape[-1]
    bt = batch_tile or _pick_batch_tile(B, S)
    assert B % bt == 0 and D % num_heads == 0

    weights = [stacked[n] for n in ("wqkvo", "w1", "w2", "vecs")]
    weight_bytes = sum(int(w.size) * w.dtype.itemsize for w in weights)
    per_block_bytes = weight_bytes // L
    # Keep the whole stack's weights resident in VMEM when they comfortably fit
    # (avoids re-streaming them for every batch tile); otherwise stream per block.
    resident = weight_bytes <= (16 << 20)

    in_specs = [pl.BlockSpec((bt, S, D), lambda i, l: (i, 0, 0))]
    for w in weights:
        nd = w.ndim
        if resident:
            in_specs.append(pl.BlockSpec(w.shape, lambda i, l, nd=nd: (0,) * nd))
        else:
            in_specs.append(pl.BlockSpec((1,) + w.shape[1:],
                                         lambda i, l, nd=nd: (l,) + (0,) * (nd - 1)))

    # Working-set estimate: double-buffered activation tiles + carry + weights
    # + in-kernel temporaries (qkv, ffn hidden, per-head scores, x1/x2, ...).
    R = bt * S
    act_tile = R * D * 4
    wbytes = weight_bytes if resident else 2 * per_block_bytes
    temporaries = 4 * (R * 3 * D + R * F + bt * S * S + 6 * R * D)
    needed = 4 * act_tile + act_tile + wbytes + temporaries

    kernel = functools.partial(encoder_stack_kernel,
                               num_heads=num_heads, resident=resident)
    return pl.pallas_call(
        kernel,
        out_shape=jax.ShapeDtypeStruct((B, S, D), jnp.float32),
        grid=(B // bt, L),
        in_specs=in_specs,
        out_specs=pl.BlockSpec((bt, S, D), lambda i, l: (i, 0, 0)),
        scratch_shapes=[pltpu.VMEM((R, D), jnp.float32)],
        compiler_params=pltpu.CompilerParams(
            dimension_semantics=("parallel", "arbitrary"),
            vmem_limit_bytes=_pick_vmem_limit(needed)),
    )(x, *weights)


# --------------------------------------------------------------------------------------
# Parameter construction + plain-JAX glue (embedding gather, sinusoidal PE table).
# --------------------------------------------------------------------------------------
def make_positional_encoding(max_length, d_model):
    pos = jnp.arange(max_length, dtype=jnp.float32)[:, None]
    i = jnp.arange(0, d_model, 2, dtype=jnp.float32)[None, :]
    angle = pos / jnp.power(10000.0, i / d_model)
    pe = jnp.zeros((max_length, d_model), dtype=jnp.float32)
    pe = pe.at[:, 0::2].set(jnp.sin(angle))
    pe = pe.at[:, 1::2].set(jnp.cos(angle))
    return pe


def init_block_params(key, d_model, d_ff):
    ks = jax.random.split(key, 6)
    s = 0.05
    return {
        "wq": jax.random.normal(ks[0], (d_model, d_model), jnp.float32) * s,
        "bq": jnp.zeros((1, d_model), jnp.float32),
        "wk": jax.random.normal(ks[1], (d_model, d_model), jnp.float32) * s,
        "bk": jnp.zeros((1, d_model), jnp.float32),
        "wv": jax.random.normal(ks[2], (d_model, d_model), jnp.float32) * s,
        "bv": jnp.zeros((1, d_model), jnp.float32),
        "wo": jax.random.normal(ks[3], (d_model, d_model), jnp.float32) * s,
        "bo": jnp.zeros((1, d_model), jnp.float32),
        "g1": jnp.ones((1, d_model), jnp.float32),
        "be1": jnp.zeros((1, d_model), jnp.float32),
        "w1": jax.random.normal(ks[4], (d_model, d_ff), jnp.float32) * s,
        "bf1": jnp.zeros((1, d_ff), jnp.float32),
        "w2": jax.random.normal(ks[5], (d_ff, d_model), jnp.float32) * s,
        "bf2": jnp.zeros((1, d_model), jnp.float32),
        "g2": jnp.ones((1, d_model), jnp.float32),
        "be2": jnp.zeros((1, d_model), jnp.float32),
    }


def stack_block_params(block_params):
    """Consolidate per-block params into 4 slabs:
       wqkvo (L,D,4D) bf16, w1 (L,D,F) bf16, w2 (L,F,D) bf16, vecs (L,8,P) f32."""
    D = block_params[0]["wq"].shape[0]
    F = block_params[0]["w1"].shape[1]
    P = max(3 * D, F, D)

    def vec(p, *names):
        v = jnp.concatenate([p[n].reshape(-1) for n in names])
        return jnp.pad(v, (0, P - v.shape[0]))

    wqkvo = jnp.stack([jnp.concatenate([p["wq"], p["wk"], p["wv"], p["wo"]], axis=1)
                       for p in block_params]).astype(jnp.bfloat16)
    w1 = jnp.stack([p["w1"] for p in block_params]).astype(jnp.bfloat16)
    w2 = jnp.stack([p["w2"] for p in block_params]).astype(jnp.bfloat16)
    vecs = jnp.stack([jnp.stack([vec(p, "bq", "bk", "bv"), vec(p, "bf1"),
                                 vec(p, "bo"), vec(p, "g1"), vec(p, "be1"),
                                 vec(p, "bf2"), vec(p, "g2"), vec(p, "be2")])
                      for p in block_params])
    return {"wqkvo": wqkvo, "w1": w1, "w2": w2, "vecs": vecs}


def encoder_forward(token_ids, emb_table, pe_table, stacked_params, num_heads):
    # embedding gather + positional encoding (plain-JAX glue)
    emb = jnp.take(emb_table, token_ids, axis=0)             # (B, S, D)
    x = emb + pe_table[: token_ids.shape[1]][None, :, :]
    return encoder_stack_pallas(x, stacked_params, num_heads)


# --------------------------------------------------------------------------------------
# Plain-JAX float32 reference (mirrors the PyTorch forward) for a sanity check.
# --------------------------------------------------------------------------------------
def encoder_block_ref(x, p, num_heads):
    B, S, D = x.shape
    H, Dh = num_heads, D // num_heads
    q = x @ p["wq"] + p["bq"]
    k = x @ p["wk"] + p["bk"]
    v = x @ p["wv"] + p["bv"]
    qh = q.reshape(B, S, H, Dh).transpose(0, 2, 1, 3)
    kh = k.reshape(B, S, H, Dh).transpose(0, 2, 1, 3)
    vh = v.reshape(B, S, H, Dh).transpose(0, 2, 1, 3)
    s = jnp.einsum("bhsd,bhtd->bhst", qh, kh) / jnp.sqrt(jnp.float32(Dh))
    a = jax.nn.softmax(s, axis=-1)
    ctx = jnp.einsum("bhst,bhtd->bhsd", a, vh).transpose(0, 2, 1, 3).reshape(B, S, D)
    attn = ctx @ p["wo"] + p["bo"]
    x1 = _layer_norm(attn, p["g1"], p["be1"]) + x
    ff = jnp.maximum(x1 @ p["w1"] + p["bf1"], 0.0) @ p["w2"] + p["bf2"]
    return _layer_norm(ff, p["g2"], p["be2"]) + x1


def encoder_ref(token_ids, emb_table, pe_table, block_params, num_heads):
    emb = jnp.take(emb_table, token_ids, axis=0)
    x = emb + pe_table[: token_ids.shape[1]][None, :, :]
    for p in block_params:
        x = encoder_block_ref(x, p, num_heads)
    return x


# --------------------------------------------------------------------------------------
if __name__ == "__main__":
    config = dict(vocab_size=50, max_length=16, num_blocks=2,
                  d_model=32, num_heads=4, d_ff=64)
    B, S = 2, 8

    key = jax.random.PRNGKey(0)
    k_emb, k_ids, *k_blocks = jax.random.split(key, 2 + config["num_blocks"])

    emb_table = jax.random.normal(
        k_emb, (config["vocab_size"], config["d_model"]), jnp.float32) * 0.1
    pe_table = make_positional_encoding(config["max_length"], config["d_model"])
    block_params = [init_block_params(kb, config["d_model"], config["d_ff"])
                    for kb in k_blocks]
    stacked_params = stack_block_params(block_params)

    token_ids = jax.random.randint(k_ids, (B, S), 0, config["vocab_size"], jnp.int32)

    out = encoder_forward(token_ids, emb_table, pe_table, stacked_params,
                          config["num_heads"])
    out = jax.block_until_ready(out)

    ref = encoder_ref(token_ids, emb_table, pe_table, block_params,
                      config["num_heads"])
    assert out.shape == (B, S, config["d_model"])
    # Mixed-precision (bf16 MXU operands, approx softmax reciprocal) vs f32 reference.
    rel_err = float(jnp.linalg.norm(out - ref) / jnp.linalg.norm(ref))
    assert rel_err < 0.05, f"relative error {rel_err}"

    print("KERNEL_OK")
</pallas_src>

<mosaic_0001>
module attributes {stable_mosaic.version = 11 : i64} {
  func.func @encoder_stack_kernel(%arg0: i32, %arg1: i32, %arg2: memref<1x8x32xf32, #tpu.memory_space<vmem>>, %arg3: memref<2x32x128xbf16, #tpu.memory_space<vmem>>, %arg4: memref<2x32x64xbf16, #tpu.memory_space<vmem>>, %arg5: memref<2x64x32xbf16, #tpu.memory_space<vmem>>, %arg6: memref<2x8x96xf32, #tpu.memory_space<vmem>>, %arg7: memref<1x8x32xf32, #tpu.memory_space<vmem>>, %arg8: memref<8x32xf32, #tpu.memory_space<vmem>>) attributes {dimension_semantics = [#tpu.dimension_semantics<parallel>, #tpu.dimension_semantics<arbitrary>], iteration_bounds = array<i64: 2, 2>, scalar_prefetch = 0 : i64, scratch_operands = 1 : i64, tpu.core_type = #tpu.core_type<tc>, window_params = [{transform_indices = @transform_0, window_bounds = array<i64: 1, 8, 32>}, {pipeline_mode = #tpu.pipeline_mode<synchronous>, transform_indices = @transform_1, window_bounds = array<i64: 2, 32, 128>}, {pipeline_mode = #tpu.pipeline_mode<synchronous>, transform_indices = @transform_2, window_bounds = array<i64: 2, 32, 64>}, {pipeline_mode = #tpu.pipeline_mode<synchronous>, transform_indices = @transform_3, window_bounds = array<i64: 2, 64, 32>}, {pipeline_mode = #tpu.pipeline_mode<synchronous>, transform_indices = @transform_4, window_bounds = array<i64: 2, 8, 96>}, {transform_indices = @transform_5, window_bounds = array<i64: 1, 8, 32>}]} {
    %c0_i32 = arith.constant 0 : i32
    %0 = arith.cmpi eq, %arg1, %c0_i32 : i32
    %1 = arith.extui %0 : i1 to i32
    %c0_i32_0 = arith.constant 0 : i32
    %2 = arith.cmpi ne, %1, %c0_i32_0 : i32
    scf.if %2 {
      %c0_47 = arith.constant 0 : index
      %c0_48 = arith.constant 0 : index
      %c0_49 = arith.constant 0 : index
      %197 = vector.load %arg2[%c0_47, %c0_48, %c0_49] : memref<1x8x32xf32, #tpu.memory_space<vmem>>, vector<1x8x32xf32>
      %198 = vector.shape_cast %197 : vector<1x8x32xf32> to vector<8x32xf32>
      %c0_50 = arith.constant 0 : index
      %c0_51 = arith.constant 0 : index
      %199 = vector.load %arg8[%c0_50, %c0_51] : memref<8x32xf32, #tpu.memory_space<vmem>>, vector<8x32xf32>
      tpu.vector_store %arg8[%c0_50, %c0_51], %198 {strides = array<i32>} : memref<8x32xf32, #tpu.memory_space<vmem>>, vector<8x32xf32>,
    } else {
    }
    %c0 = arith.constant 0 : index
    %c0_1 = arith.constant 0 : index
    %3 = vector.load %arg8[%c0, %c0_1] : memref<8x32xf32, #tpu.memory_space<vmem>>, vector<8x32xf32>
    %4 = arith.truncf %3 : vector<8x32xf32> to vector<8x32xbf16>
    %5 = arith.index_cast %arg1 : i32 to index
    %c0_2 = arith.constant 0 : index
    %c0_3 = arith.constant 0 : index
    %6 = vector.load %arg3[%5, %c0_2, %c0_3] : memref<2x32x128xbf16, #tpu.memory_space<vmem>>, vector<1x32x128xbf16>
    %7 = vector.shape_cast %6 : vector<1x32x128xbf16> to vector<32x128xbf16>
    %8 = arith.index_cast %arg1 : i32 to index
    %c0_4 = arith.constant 0 : index
    %c0_5 = arith.constant 0 : index
    %9 = vector.load %arg4[%8, %c0_4, %c0_5] : memref<2x32x64xbf16, #tpu.memory_space<vmem>>, vector<1x32x64xbf16>
    %10 = vector.shape_cast %9 : vector<1x32x64xbf16> to vector<32x64xbf16>
    %11 = arith.index_cast %arg1 : i32 to index
    %c0_6 = arith.constant 0 : index
    %c0_7 = arith.constant 0 : index
    %12 = vector.load %arg5[%11, %c0_6, %c0_7] : memref<2x64x32xbf16, #tpu.memory_space<vmem>>, vector<1x64x32xbf16>
    %13 = vector.shape_cast %12 : vector<1x64x32xbf16> to vector<64x32xbf16>
    %14 = arith.index_cast %arg1 : i32 to index
    %c0_8 = arith.constant 0 : index
    %c0_9 = arith.constant 0 : index
    %15 = vector.load %arg6[%14, %c0_8, %c0_9] : memref<2x8x96xf32, #tpu.memory_space<vmem>>, vector<1x8x96xf32>
    %16 = vector.shape_cast %15 : vector<1x8x96xf32> to vector<8x96xf32>
    %17 = vector.extract_strided_slice %16 {offsets = [0, 0], sizes = [1, 96], strides = [1, 1]} : vector<8x96xf32> to vector<1x96xf32>
    %18 = vector.extract_strided_slice %16 {offsets = [1, 0], sizes = [1, 64], strides = [1, 1]} : vector<8x96xf32> to vector<1x64xf32>
    %19 = vector.extract_strided_slice %16 {offsets = [2, 0], sizes = [1, 32], strides = [1, 1]} : vector<8x96xf32> to vector<1x32xf32>
    %20 = vector.extract_strided_slice %16 {offsets = [3, 0], sizes = [1, 32], strides = [1, 1]} : vector<8x96xf32> to vector<1x32xf32>
    %21 = vector.extract_strided_slice %16 {offsets = [4, 0], sizes = [1, 32], strides = [1, 1]} : vector<8x96xf32> to vector<1x32xf32>
    %22 = vector.extract_strided_slice %16 {offsets = [5, 0], sizes = [1, 32], strides = [1, 1]} : vector<8x96xf32> to vector<1x32xf32>
    %23 = vector.extract_strided_slice %16 {offsets = [6, 0], sizes = [1, 32], strides = [1, 1]} : vector<8x96xf32> to vector<1x32xf32>
    %24 = vector.extract_strided_slice %16 {offsets = [7, 0], sizes = [1, 32], strides = [1, 1]} : vector<8x96xf32> to vector<1x32xf32>
    %25 = vector.extract_strided_slice %7 {offsets = [0, 0], sizes = [32, 96], strides = [1, 1]} : vector<32x128xbf16> to vector<32x96xbf16>
    %cst = arith.constant dense<0.000000e+00> : vector<8x96xf32>
    %26 = tpu.matmul %4, %25, %cst {dimension_numbers = #tpu.dot_dimension_numbers<[1], [0], [0], [1], [0, 0, 1, 1], [], []>} : vector<8x32xbf16>, vector<32x96xbf16>, vector<8x96xf32> -> vector<8x96xf32>
    %27 = vector.broadcast %17 : vector<1x96xf32> to vector<8x96xf32>
    %28 = arith.addf %26, %27 : vector<8x96xf32>
    %29 = vector.extract_strided_slice %28 {offsets = [0, 0], sizes = [8, 8], strides = [1, 1]} : vector<8x96xf32> to vector<8x8xf32>
    %30 = vector.shape_cast %29 : vector<8x8xf32> to vector<1x8x8xf32>
    %31 = arith.truncf %30 : vector<1x8x8xf32> to vector<1x8x8xbf16>
    %32 = vector.extract_strided_slice %28 {offsets = [0, 32], sizes = [8, 8], strides = [1, 1]} : vector<8x96xf32> to vector<8x8xf32>
    %33 = vector.shape_cast %32 : vector<8x8xf32> to vector<1x8x8xf32>
    %34 = arith.truncf %33 : vector<1x8x8xf32> to vector<1x8x8xbf16>
    %35 = vector.extract_strided_slice %28 {offsets = [0, 64], sizes = [8, 8], strides = [1, 1]} : vector<8x96xf32> to vector<8x8xf32>
    %36 = vector.shape_cast %35 : vector<8x8xf32> to vector<1x8x8xf32>
    %37 = arith.truncf %36 : vector<1x8x8xf32> to vector<1x8x8xbf16>
    "tpu.trace_start"() <{level = 10 : i32, message = "bqd,bkd->bqk"}> : () -> ()
    %cst_10 = arith.constant dense<0.000000e+00> : vector<1x8x8xf32>
    %38 = tpu.matmul %31, %34, %cst_10 {dimension_numbers = #tpu.dot_dimension_numbers<[2], [2], [1], [1], [0, 0, 0, 1, 1, 1], [0], [0]>} : vector<1x8x8xbf16>, vector<1x8x8xbf16>, vector<1x8x8xf32> -> vector<1x8x8xf32>
    "tpu.trace_stop"() : () -> ()
    %cst_11 = arith.constant 0.353553385 : f32
    %39 = vector.broadcast %cst_11 : f32 to vector<1x8x8xf32>
    %40 = arith.mulf %38, %39 : vector<1x8x8xf32>
    %cst_12 = arith.constant dense<0xFF800000> : vector<1x8xf32>
    %41 = vector.multi_reduction <maximumf>, %40, %cst_12 [2] : vector<1x8x8xf32> to vector<1x8xf32>
    %42 = vector.shape_cast %41 : vector<1x8xf32> to vector<1x8x1xf32>
    %43 = vector.broadcast %42 : vector<1x8x1xf32> to vector<1x8x8xf32>
    %44 = arith.subf %40, %43 : vector<1x8x8xf32>
    %45 = math.exp %44 : vector<1x8x8xf32>
    %cst_13 = arith.constant dense<0.000000e+00> : vector<1x8xf32>
    %46 = vector.multi_reduction <add>, %45, %cst_13 [2] : vector<1x8x8xf32> to vector<1x8xf32>
    %47 = vector.shape_cast %46 : vector<1x8xf32> to vector<1x8x1xf32>
    %48 = tpu.reciprocal %47 {approx = true} : vector<1x8x1xf32> -> vector<1x8x1xf32>
    %49 = vector.broadcast %48 : vector<1x8x1xf32> to vector<1x8x8xf32>
    %50 = arith.mulf %45, %49 : vector<1x8x8xf32>
    %51 = arith.truncf %50 : vector<1x8x8xf32> to vector<1x8x8xbf16>
    "tpu.trace_start"() <{level = 10 : i32, message = "bqk,bkd->bqd"}> : () -> ()
    %cst_14 = arith.constant dense<0.000000e+00> : vector<1x8x8xf32>
    %52 = tpu.matmul %51, %37, %cst_14 {dimension_numbers = #tpu.dot_dimension_numbers<[2], [1], [1], [2], [0, 0, 0, 1, 1, 2], [0], [0]>} : vector<1x8x8xbf16>, vector<1x8x8xbf16>, vector<1x8x8xf32> -> vector<1x8x8xf32>
    "tpu.trace_stop"() : () -> ()
    %53 = vector.shape_cast %52 : vector<1x8x8xf32> to vector<8x8xf32>
    %54 = vector.extract_strided_slice %28 {offsets = [0, 8], sizes = [8, 8], strides = [1, 1]} : vector<8x96xf32> to vector<8x8xf32>
    %55 = vector.shape_cast %54 : vector<8x8xf32> to vector<1x8x8xf32>
    %56 = arith.truncf %55 : vector<1x8x8xf32> to vector<1x8x8xbf16>
    %57 = vector.extract_strided_slice %28 {offsets = [0, 40], sizes = [8, 8], strides = [1, 1]} : vector<8x96xf32> to vector<8x8xf32>
    %58 = vector.shape_cast %57 : vector<8x8xf32> to vector<1x8x8xf32>
    %59 = arith.truncf %58 : vector<1x8x8xf32> to vector<1x8x8xbf16>
    %60 = vector.extract_strided_slice %28 {offsets = [0, 72], sizes = [8, 8], strides = [1, 1]} : vector<8x96xf32> to vector<8x8xf32>
    %61 = vector.shape_cast %60 : vector<8x8xf32> to vector<1x8x8xf32>
    %62 = arith.truncf %61 : vector<1x8x8xf32> to vector<1x8x8xbf16>
    "tpu.trace_start"() <{level = 10 : i32, message = "bqd,bkd->bqk"}> : () -> ()
    %cst_15 = arith.constant dense<0.000000e+00> : vector<1x8x8xf32>
    %63 = tpu.matmul %56, %59, %cst_15 {dimension_numbers = #tpu.dot_dimension_numbers<[2], [2], [1], [1], [0, 0, 0, 1, 1, 1], [0], [0]>} : vector<1x8x8xbf16>, vector<1x8x8xbf16>, vector<1x8x8xf32> -> vector<1x8x8xf32>
    "tpu.trace_stop"() : () -> ()
    %cst_16 = arith.constant 0.353553385 : f32
    %64 = vector.broadcast %cst_16 : f32 to vector<1x8x8xf32>
    %65 = arith.mulf %63, %64 : vector<1x8x8xf32>
    %cst_17 = arith.constant dense<0xFF800000> : vector<1x8xf32>
    %66 = vector.multi_reduction <maximumf>, %65, %cst_17 [2] : vector<1x8x8xf32> to vector<1x8xf32>
    %67 = vector.shape_cast %66 : vector<1x8xf32> to vector<1x8x1xf32>
    %68 = vector.broadcast %67 : vector<1x8x1xf32> to vector<1x8x8xf32>
    %69 = arith.subf %65, %68 : vector<1x8x8xf32>
    %70 = math.exp %69 : vector<1x8x8xf32>
    %cst_18 = arith.constant dense<0.000000e+00> : vector<1x8xf32>
    %71 = vector.multi_reduction <add>, %70, %cst_18 [2] : vector<1x8x8xf32> to vector<1x8xf32>
    %72 = vector.shape_cast %71 : vector<1x8xf32> to vector<1x8x1xf32>
    %73 = tpu.reciprocal %72 {approx = true} : vector<1x8x1xf32> -> vector<1x8x1xf32>
    %74 = vector.broadcast %73 : vector<1x8x1xf32> to vector<1x8x8xf32>
    %75 = arith.mulf %70, %74 : vector<1x8x8xf32>
    %76 = arith.truncf %75 : vector<1x8x8xf32> to vector<1x8x8xbf16>
    "tpu.trace_start"() <{level = 10 : i32, message = "bqk,bkd->bqd"}> : () -> ()
    %cst_19 = arith.constant dense<0.000000e+00> : vector<1x8x8xf32>
    %77 = tpu.matmul %76, %62, %cst_19 {dimension_numbers = #tpu.dot_dimension_numbers<[2], [1], [1], [2], [0, 0, 0, 1, 1, 2], [0], [0]>} : vector<1x8x8xbf16>, vector<1x8x8xbf16>, vector<1x8x8xf32> -> vector<1x8x8xf32>
    "tpu.trace_stop"() : () -> ()
    %78 = vector.shape_cast %77 : vector<1x8x8xf32> to vector<8x8xf32>
    %79 = vector.extract_strided_slice %28 {offsets = [0, 16], sizes = [8, 8], strides = [1, 1]} : vector<8x96xf32> to vector<8x8xf32>
    %80 = vector.shape_cast %79 : vector<8x8xf32> to vector<1x8x8xf32>
    %81 = arith.truncf %80 : vector<1x8x8xf32> to vector<1x8x8xbf16>
    %82 = vector.extract_strided_slice %28 {offsets = [0, 48], sizes = [8, 8], strides = [1, 1]} : vector<8x96xf32> to vector<8x8xf32>
    %83 = vector.shape_cast %82 : vector<8x8xf32> to vector<1x8x8xf32>
    %84 = arith.truncf %83 : vector<1x8x8xf32> to vector<1x8x8xbf16>
    %85 = vector.extract_strided_slice %28 {offsets = [0, 80], sizes = [8, 8], strides = [1, 1]} : vector<8x96xf32> to vector<8x8xf32>
    %86 = vector.shape_cast %85 : vector<8x8xf32> to vector<1x8x8xf32>
    %87 = arith.truncf %86 : vector<1x8x8xf32> to vector<1x8x8xbf16>
    "tpu.trace_start"() <{level = 10 : i32, message = "bqd,bkd->bqk"}> : () -> ()
    %cst_20 = arith.constant dense<0.000000e+00> : vector<1x8x8xf32>
    %88 = tpu.matmul %81, %84, %cst_20 {dimension_numbers = #tpu.dot_dimension_numbers<[2], [2], [1], [1], [0, 0, 0, 1, 1, 1], [0], [0]>} : vector<1x8x8xbf16>, vector<1x8x8xbf16>, vector<1x8x8xf32> -> vector<1x8x8xf32>
    "tpu.trace_stop"() : () -> ()
    %cst_21 = arith.constant 0.353553385 : f32
    %89 = vector.broadcast %cst_21 : f32 to vector<1x8x8xf32>
    %90 = arith.mulf %88, %89 : vector<1x8x8xf32>
    %cst_22 = arith.constant dense<0xFF800000> : vector<1x8xf32>
    %91 = vector.multi_reduction <maximumf>, %90, %cst_22 [2] : vector<1x8x8xf32> to vector<1x8xf32>
    %92 = vector.shape_cast %91 : vector<1x8xf32> to vector<1x8x1xf32>
    %93 = vector.broadcast %92 : vector<1x8x1xf32> to vector<1x8x8xf32>
    %94 = arith.subf %90, %93 : vector<1x8x8xf32>
    %95 = math.exp %94 : vector<1x8x8xf32>
    %cst_23 = arith.constant dense<0.000000e+00> : vector<1x8xf32>
    %96 = vector.multi_reduction <add>, %95, %cst_23 [2] : vector<1x8x8xf32> to vector<1x8xf32>
    %97 = vector.shape_cast %96 : vector<1x8xf32> to vector<1x8x1xf32>
    %98 = tpu.reciprocal %97 {approx = true} : vector<1x8x1xf32> -> vector<1x8x1xf32>
    %99 = vector.broadcast %98 : vector<1x8x1xf32> to vector<1x8x8xf32>
    %100 = arith.mulf %95, %99 : vector<1x8x8xf32>
    %101 = arith.truncf %100 : vector<1x8x8xf32> to vector<1x8x8xbf16>
    "tpu.trace_start"() <{level = 10 : i32, message = "bqk,bkd->bqd"}> : () -> ()
    %cst_24 = arith.constant dense<0.000000e+00> : vector<1x8x8xf32>
    %102 = tpu.matmul %101, %87, %cst_24 {dimension_numbers = #tpu.dot_dimension_numbers<[2], [1], [1], [2], [0, 0, 0, 1, 1, 2], [0], [0]>} : vector<1x8x8xbf16>, vector<1x8x8xbf16>, vector<1x8x8xf32> -> vector<1x8x8xf32>
    "tpu.trace_stop"() : () -> ()
    %103 = vector.shape_cast %102 : vector<1x8x8xf32> to vector<8x8xf32>
    %104 = vector.extract_strided_slice %28 {offsets = [0, 24], sizes = [8, 8], strides = [1, 1]} : vector<8x96xf32> to vector<8x8xf32>
    %105 = vector.shape_cast %104 : vector<8x8xf32> to vector<1x8x8xf32>
    %106 = arith.truncf %105 : vector<1x8x8xf32> to vector<1x8x8xbf16>
    %107 = vector.extract_strided_slice %28 {offsets = [0, 56], sizes = [8, 8], strides = [1, 1]} : vector<8x96xf32> to vector<8x8xf32>
    %108 = vector.shape_cast %107 : vector<8x8xf32> to vector<1x8x8xf32>
    %109 = arith.truncf %108 : vector<1x8x8xf32> to vector<1x8x8xbf16>
    %110 = vector.extract_strided_slice %28 {offsets = [0, 88], sizes = [8, 8], strides = [1, 1]} : vector<8x96xf32> to vector<8x8xf32>
    %111 = vector.shape_cast %110 : vector<8x8xf32> to vector<1x8x8xf32>
    %112 = arith.truncf %111 : vector<1x8x8xf32> to vector<1x8x8xbf16>
    "tpu.trace_start"() <{level = 10 : i32, message = "bqd,bkd->bqk"}> : () -> ()
    %cst_25 = arith.constant dense<0.000000e+00> : vector<1x8x8xf32>
    %113 = tpu.matmul %106, %109, %cst_25 {dimension_numbers = #tpu.dot_dimension_numbers<[2], [2], [1], [1], [0, 0, 0, 1, 1, 1], [0], [0]>} : vector<1x8x8xbf16>, vector<1x8x8xbf16>, vector<1x8x8xf32> -> vector<1x8x8xf32>
    "tpu.trace_stop"() : () -> ()
    %cst_26 = arith.constant 0.353553385 : f32
    %114 = vector.broadcast %cst_26 : f32 to vector<1x8x8xf32>
    %115 = arith.mulf %113, %114 : vector<1x8x8xf32>
    %cst_27 = arith.constant dense<0xFF800000> : vector<1x8xf32>
    %116 = vector.multi_reduction <maximumf>, %115, %cst_27 [2] : vector<1x8x8xf32> to vector<1x8xf32>
    %117 = vector.shape_cast %116 : vector<1x8xf32> to vector<1x8x1xf32>
    %118 = vector.broadcast %117 : vector<1x8x1xf32> to vector<1x8x8xf32>
    %119 = arith.subf %115, %118 : vector<1x8x8xf32>
    %120 = math.exp %119 : vector<1x8x8xf32>
    %cst_28 = arith.constant dense<0.000000e+00> : vector<1x8xf32>
    %121 = vector.multi_reduction <add>, %120, %cst_28 [2] : vector<1x8x8xf32> to vector<1x8xf32>
    %122 = vector.shape_cast %121 : vector<1x8xf32> to vector<1x8x1xf32>
    %123 = tpu.reciprocal %122 {approx = true} : vector<1x8x1xf32> -> vector<1x8x1xf32>
    %124 = vector.broadcast %123 : vector<1x8x1xf32> to vector<1x8x8xf32>
    %125 = arith.mulf %120, %124 : vector<1x8x8xf32>
    %126 = arith.truncf %125 : vector<1x8x8xf32> to vector<1x8x8xbf16>
    "tpu.trace_start"() <{level = 10 : i32, message = "bqk,bkd->bqd"}> : () -> ()
    %cst_29 = arith.constant dense<0.000000e+00> : vector<1x8x8xf32>
    %127 = tpu.matmul %126, %112, %cst_29 {dimension_numbers = #tpu.dot_dimension_numbers<[2], [1], [1], [2], [0, 0, 0, 1, 1, 2], [0], [0]>} : vector<1x8x8xbf16>, vector<1x8x8xbf16>, vector<1x8x8xf32> -> vector<1x8x8xf32>
    "tpu.trace_stop"() : () -> ()
    %128 = vector.shape_cast %127 : vector<1x8x8xf32> to vector<8x8xf32>
    %129 = tpu.concatenate %53, %78, %103, %128 in 1 : vector<8x8xf32>, vector<8x8xf32>, vector<8x8xf32>, vector<8x8xf32> -> vector<8x32xf32>
    %130 = arith.truncf %129 : vector<8x32xf32> to vector<8x32xbf16>
    %131 = vector.extract_strided_slice %7 {offsets = [0, 96], sizes = [32, 32], strides = [1, 1]} : vector<32x128xbf16> to vector<32x32xbf16>
    %cst_30 = arith.constant dense<0.000000e+00> : vector<8x32xf32>
    %132 = tpu.matmul %130, %131, %cst_30 {dimension_numbers = #tpu.dot_dimension_numbers<[1], [0], [0], [1], [0, 0, 1, 1], [], []>} : vector<8x32xbf16>, vector<32x32xbf16>, vector<8x32xf32> -> vector<8x32xf32>
    %133 = vector.broadcast %19 : vector<1x32xf32> to vector<8x32xf32>
    %134 = arith.addf %132, %133 : vector<8x32xf32>
    %cst_31 = arith.constant dense<0.000000e+00> : vector<8xf32>
    %135 = vector.multi_reduction <add>, %134, %cst_31 [1] : vector<8x32xf32> to vector<8xf32>
    %136 = vector.shape_cast %135 : vector<8xf32> to vector<8x1xf32>
    %cst_32 = arith.constant 3.200000e+01 : f32
    %137 = vector.broadcast %cst_32 : f32 to vector<8x1xf32>
    %138 = arith.divf %136, %137 : vector<8x1xf32>
    %139 = vector.broadcast %138 : vector<8x1xf32> to vector<8x32xf32>
    %140 = arith.subf %134, %139 : vector<8x32xf32>
    %141 = arith.mulf %140, %140 : vector<8x32xf32>
    %cst_33 = arith.constant dense<0.000000e+00> : vector<8xf32>
    %142 = vector.multi_reduction <add>, %141, %cst_33 [1] : vector<8x32xf32> to vector<8xf32>
    %143 = vector.shape_cast %142 : vector<8xf32> to vector<8x1xf32>
    %cst_34 = arith.constant 3.200000e+01 : f32
    %144 = vector.broadcast %cst_34 : f32 to vector<8x1xf32>
    %145 = arith.divf %143, %144 : vector<8x1xf32>
    %146 = vector.broadcast %138 : vector<8x1xf32> to vector<8x32xf32>
    %147 = arith.subf %134, %146 : vector<8x32xf32>
    %cst_35 = arith.constant 9.99999974E-6 : f32
    %148 = vector.broadcast %cst_35 : f32 to vector<8x1xf32>
    %149 = arith.addf %145, %148 : vector<8x1xf32>
    %150 = math.rsqrt %149 : vector<8x1xf32>
    %151 = vector.broadcast %150 : vector<8x1xf32> to vector<8x32xf32>
    %152 = arith.mulf %147, %151 : vector<8x32xf32>
    %153 = vector.broadcast %20 : vector<1x32xf32> to vector<8x32xf32>
    %154 = arith.mulf %152, %153 : vector<8x32xf32>
    %155 = vector.broadcast %21 : vector<1x32xf32> to vector<8x32xf32>
    %156 = arith.addf %154, %155 : vector<8x32xf32>
    %157 = arith.addf %156, %3 : vector<8x32xf32>
    %158 = arith.truncf %157 : vector<8x32xf32> to vector<8x32xbf16>
    %cst_36 = arith.constant dense<0.000000e+00> : vector<8x64xf32>
    %159 = tpu.matmul %158, %10, %cst_36 {dimension_numbers = #tpu.dot_dimension_numbers<[1], [0], [0], [1], [0, 0, 1, 1], [], []>} : vector<8x32xbf16>, vector<32x64xbf16>, vector<8x64xf32> -> vector<8x64xf32>
    %160 = vector.broadcast %18 : vector<1x64xf32> to vector<8x64xf32>
    %161 = arith.addf %159, %160 : vector<8x64xf32>
    %cst_37 = arith.constant 0.000000e+00 : f32
    %162 = vector.broadcast %cst_37 : f32 to vector<8x64xf32>
    %163 = arith.maximumf %161, %162 : vector<8x64xf32>
    %164 = arith.truncf %163 : vector<8x64xf32> to vector<8x64xbf16>
    %cst_38 = arith.constant dense<0.000000e+00> : vector<8x32xf32>
    %165 = tpu.matmul %164, %13, %cst_38 {dimension_numbers = #tpu.dot_dimension_numbers<[1], [0], [0], [1], [0, 0, 1, 1], [], []>} : vector<8x64xbf16>, vector<64x32xbf16>, vector<8x32xf32> -> vector<8x32xf32>
    %166 = vector.broadcast %22 : vector<1x32xf32> to vector<8x32xf32>
    %167 = arith.addf %165, %166 : vector<8x32xf32>
    %cst_39 = arith.constant dense<0.000000e+00> : vector<8xf32>
    %168 = vector.multi_reduction <add>, %167, %cst_39 [1] : vector<8x32xf32> to vector<8xf32>
    %169 = vector.shape_cast %168 : vector<8xf32> to vector<8x1xf32>
    %cst_40 = arith.constant 3.200000e+01 : f32
    %170 = vector.broadcast %cst_40 : f32 to vector<8x1xf32>
    %171 = arith.divf %169, %170 : vector<8x1xf32>
    %172 = vector.broadcast %171 : vector<8x1xf32> to vector<8x32xf32>
    %173 = arith.subf %167, %172 : vector<8x32xf32>
    %174 = arith.mulf %173, %173 : vector<8x32xf32>
    %cst_41 = arith.constant dense<0.000000e+00> : vector<8xf32>
    %175 = vector.multi_reduction <add>, %174, %cst_41 [1] : vector<8x32xf32> to vector<8xf32>
    %176 = vector.shape_cast %175 : vector<8xf32> to vector<8x1xf32>
    %cst_42 = arith.constant 3.200000e+01 : f32
    %177 = vector.broadcast %cst_42 : f32 to vector<8x1xf32>
    %178 = arith.divf %176, %177 : vector<8x1xf32>
    %179 = vector.broadcast %171 : vector<8x1xf32> to vector<8x32xf32>
    %180 = arith.subf %167, %179 : vector<8x32xf32>
    %cst_43 = arith.constant 9.99999974E-6 : f32
    %181 = vector.broadcast %cst_43 : f32 to vector<8x1xf32>
    %182 = arith.addf %178, %181 : vector<8x1xf32>
    %183 = math.rsqrt %182 : vector<8x1xf32>
    %184 = vector.broadcast %183 : vector<8x1xf32> to vector<8x32xf32>
    %185 = arith.mulf %180, %184 : vector<8x32xf32>
    %186 = vector.broadcast %23 : vector<1x32xf32> to vector<8x32xf32>
    %187 = arith.mulf %185, %186 : vector<8x32xf32>
    %188 = vector.broadcast %24 : vector<1x32xf32> to vector<8x32xf32>
    %189 = arith.addf %187, %188 : vector<8x32xf32>
    %190 = arith.addf %189, %157 : vector<8x32xf32>
    %c1_i32 = arith.constant 1 : i32
    %191 = arith.cmpi slt, %arg1, %c1_i32 : i32
    %192 = arith.extui %191 : i1 to i32
    %c0_i32_44 = arith.constant 0 : i32
    %193 = arith.cmpi ne, %192, %c0_i32_44 : i32
    scf.if %193 {
      %c0_47 = arith.constant 0 : index
      %c0_48 = arith.constant 0 : index
      %197 = vector.load %arg8[%c0_47, %c0_48] : memref<8x32xf32, #tpu.memory_space<vmem>>, vector<8x32xf32>
      tpu.vector_store %arg8[%c0_47, %c0_48], %190 {strides = array<i32>} : memref<8x32xf32, #tpu.memory_space<vmem>>, vector<8x32xf32>,
    } else {
    }
    %c1_i32_45 = arith.constant 1 : i32
    %194 = arith.cmpi eq, %arg1, %c1_i32_45 : i32
    %195 = arith.extui %194 : i1 to i32
    %c0_i32_46 = arith.constant 0 : i32
    %196 = arith.cmpi ne, %195, %c0_i32_46 : i32
    scf.if %196 {
      %197 = vector.shape_cast %190 : vector<8x32xf32> to vector<1x8x32xf32>
      %c0_47 = arith.constant 0 : index
      %c0_48 = arith.constant 0 : index
      %c0_49 = arith.constant 0 : index
      %198 = vector.load %arg7[%c0_47, %c0_48, %c0_49] : memref<1x8x32xf32, #tpu.memory_space<vmem>>, vector<1x8x32xf32>
      tpu.vector_store %arg7[%c0_47, %c0_48, %c0_49], %197 {strides = array<i32>} : memref<1x8x32xf32, #tpu.memory_space<vmem>>, vector<1x8x32xf32>,
    } else {
    }
    return
  }
  func.func @transform_0(%arg0: i32, %arg1: i32) -> (i32, i32, i32) {
    %c0_i32 = arith.constant 0 : i32
    %c0_i32_0 = arith.constant 0 : i32
    %c0_i32_1 = arith.constant 0 : i32
    return %arg0, %c0_i32, %c0_i32_0 : i32, i32, i32
  }
  func.func @transform_1(%arg0: i32, %arg1: i32) -> (i32, i32, i32) {
    %c0_i32 = arith.constant 0 : i32
    %c0_i32_0 = arith.constant 0 : i32
    %c0_i32_1 = arith.constant 0 : i32
    %c0_i32_2 = arith.constant 0 : i32
    return %c0_i32, %c0_i32_0, %c0_i32_1 : i32, i32, i32
  }
  func.func @transform_2(%arg0: i32, %arg1: i32) -> (i32, i32, i32) {
    %c0_i32 = arith.constant 0 : i32
    %c0_i32_0 = arith.constant 0 : i32
    %c0_i32_1 = arith.constant 0 : i32
    %c0_i32_2 = arith.constant 0 : i32
    return %c0_i32, %c0_i32_0, %c0_i32_1 : i32, i32, i32
  }
  func.func @transform_3(%arg0: i32, %arg1: i32) -> (i32, i32, i32) {
    %c0_i32 = arith.constant 0 : i32
    %c0_i32_0 = arith.constant 0 : i32
    %c0_i32_1 = arith.constant 0 : i32
    %c0_i32_2 = arith.constant 0 : i32
    return %c0_i32, %c0_i32_0, %c0_i32_1 : i32, i32, i32
  }
  func.func @transform_4(%arg0: i32, %arg1: i32) -> (i32, i32, i32) {
    %c0_i32 = arith.constant 0 : i32
    %c0_i32_0 = arith.constant 0 : i32
    %c0_i32_1 = arith.constant 0 : i32
    %c0_i32_2 = arith.constant 0 : i32
    return %c0_i32, %c0_i32_0, %c0_i32_1 : i32, i32, i32
  }
  func.func @transform_5(%arg0: i32, %arg1: i32) -> (i32, i32, i32) {
    %c0_i32 = arith.constant 0 : i32
    %c0_i32_0 = arith.constant 0 : i32
    %c0_i32_1 = arith.constant 0 : i32
    return %arg0, %c0_i32, %c0_i32_0 : i32, i32, i32
  }
}

</mosaic_0001>

<bundles_post_ra>
// kernel: tpu_custom_call.1
= control target key start
LH: loop header
LB: loop body
LE: loop exit
PB: predicated region body
PF: predicated region fallthrough
CT: control target
= control target key end

     0   :  { %s1361_s0 = inlined_call_operand.vmem [shape: f32[2,8,32], index: 0, kind: input, shape index: {}]   ;;  %s1362_s1 = inlined_call_operand.vmem [shape: bf16[2,32,128], index: 1, kind: input, shape index: {}]   ;;  %s1363_s2 = inlined_call_operand.vmem [shape: bf16[2,32,64], index: 2, kind: input, shape index: {}]   ;;  %s1364_s3 = inlined_call_operand.vmem [shape: bf16[2,64,32], index: 3, kind: input, shape index: {}]   ;;  %s1365_s4 = inlined_call_operand.vmem [shape: f32[2,8,96], index: 4, kind: input, shape index: {}]   ;;  %s1366_s5 = inlined_call_operand.hbm [shape: f32[2,8,32], index: 5, kind: output, shape index: {}]  }
   0x1   :  { %1367 = sst [smem:[#allocation6_spill]] %s1361_s0 }
   0x2   :  { %10 = vsyncpa [#allocation4], 0 }
   0x3   :  { %12 = vsyncpa [#allocation4 + $0x1], 0  ;;  %s1135_s18 = smov 0   ;;  %s1137_s19 = smov 0  }
   0x4   :  { %s1139_s20 = smov 0   ;;  %s1141_s21 = smov 0  }
   0x5   :  { %s1143_s22 = smov 0   ;;  %s1145_s23 = smov 0  }
   0x6   :  { %s1147_s24 = smov 0   ;;  %s1149_s25 = smov 0  }
   0x7 LB: > { %s810_s26 = sadd.s32 4294967295, %s1087_s25   ;;  %s811_s27 = sadd.s32 4294967294, %s1087_s25   ;;  %s1087_s25 = sphi %s1149_s25, %s18_s25   ;;  %s1083_s24 = sphi %s1147_s24, %s1377_s24   ;;  %s1079_s23 = sphi %s1145_s23, %s1376_s23   ;;  %s1075_s22 = sphi %s1143_s22, %s1375_s22   ;;  %s1071_s21 = sphi %s1141_s21, %s1374_s21   ;;  %s1067_s20 = sphi %s1139_s20, %s1373_s20   ;;  %s1063_s19 = sphi %s1137_s19, %s1372_s19   ;;  %s1059_s18 = sphi %s1135_s18, %s1371_s18  }
   0x8   : > { %s27_s28 = sadd.s32 1, %s1079_s23  ;;  %s30_s29 = sadd.s32 1, %s1083_s24 }
   0x9   : > { %p28_p0 = scmp.ge.s32.totalorder %s27_s28, 2  ;;  %p157_p1 = scmp.ne.s32.totalorder %s1067_s20, %s1063_s19 }
   0xa   : > { %p158_p2 = scmp.eq.s32.totalorder %s810_s26, 3  ;;  %p163_p4 = scmp.ne.s32.totalorder %s1063_s19, %s1059_s18 }
   0xb   : > { %s1379_s28 = smov (%p28_p0, %s27_s28), 0  ;;  %s1381_s29 = smov (!%p28_p0, %s30_s29), %s1083_s24 }
   0xc   : > { %p1184_p3 = por %p158_p2, %p157_p1  ;;  %p32_p5 = scmp.ge.s32.totalorder %s1381_s29, 2 }
   0xd   : > { %p164_p6 = scmp.eq.s32.totalorder %s811_s27, 3  ;;  %p814_p7 = scmp.ge.s32.totalorder %s1087_s25, 1 }
   0xe   : > { %p201_p8 = scmp.lt.s32.totalorder %s1087_s25, 5  ;;  %s1383_s29 = smov (%p32_p5, %s1381_s29), 0 }
   0xf   : > { %p1194_p9 = por %p164_p6, %p163_p4  ;;  %s144_s7 = ssub.s32 %s1083_s24, %s1383_s29 }
  0x10   : > { %p202_p10 = pnand %p814_p7, %p201_p8  ;;  %s147_s8 = sadd.s32 1, %s1067_s20 }
  0x11   : > { %p145_p11 = scmp.eq.s32.totalorder %s144_s7, 0  ;;  %s225_s10 = sand.u32 (!%p202_p10), 1, %s1063_s19  }
  0x12   : > { %205 = sbr.rel (%p202_p10) target bundleno = 1945 (0x799), region = 40  ;;  %p228_p12 = scmp.lt.s32.totalorder (!%p202_p10), %s1075_s22, 1 }
  0x13   : > { %s1202_s9 = scalar_select %p145_p11, %s1067_s20, %s147_s8  }
  0x14   : > { %s1208_s11 = sshll.u32 (!%p202_p10), %s225_s10, 3  ;;  %s1370_s0 = sld [smem:[#allocation6_spill]] (!%p202_p10) }
  0x15   : > { %s227_s17 = scalar_lea.vmem (!%p202_p10), [#allocation3], %s1208_s11  ;;  %p817_p13 = scmp.ne.s32.totalorder (!%p202_p10), %s1071_s21, 0 }
  0x17   : > { %s229_s12 = scalar_select %p228_p12, %s1075_s22, 1 }
  0x18   : > { %236 = sbr.rel (%p817_p13) target bundleno = 31 (0x1f), region = 44 }
  0x19   : > { %s816_s13 = sshll.u32 %s229_s12, 3 }
  0x1a   : > { %s231_s16 = scalar_lea.vmem %s1370_s0, %s816_s13 }
  0x1d   : > { %v237_v0 = vld [vmem:[%s231_s16] sm:$0xff]  ;;  %vm238_vm0 = vcmask 261120  }
  0x1e   : > { %239 = vst.msk [vmem:[#allocation2] sm:$0xff] %vm238_vm0, %v237_v0 }
  0x1f PF: > { %s873_s26 = sshll.u32 %s1071_s21, 4  ;;  %vm281_vm1 = vcmask 261120   ;;  %s821_s12 = sshll.u32 %s1071_s21, 3  ;;  %vm304_vm2 = vcmask 64512   ;;  %vm342_vm3 = vcmask 1043456   ;;  %vm543_vm4 = vcmask 130048  }
  0x20   : > { %s244_s8 = scalar_lea.vmem %s1362_s1, %s873_s26  ;;  %s266_s15 = scalar_lea.vmem %s1365_s4, %s821_s12  ;;  %vm545_vm5 = vcmask 195584   ;;  %vm662_vm10 = vcmask 523264  }
  0x21   : > { %v1222_v1 = vld [vmem:[%s244_s8 + $0x8] sm:$0xff]  ;;  %v1225_v2 = vld [vmem:[%s244_s8] sm:$0xff]  ;;  %s1089_s16 = smov 104   ;;  %s1090_s27 = smov 120  }
  0x22   : > { %291 = vmatpush.bf16.msra.mxu0 %v1222_v1  ;;  %v1237_v5 = vld [vmem:[%s266_s15] sm:$0xff]  ;;  %s1091_s7 = smov 96   ;;  %s1092_s8 = smov 80  }
  0x23   : > { %v268_v6 = vperm.slane %v1237_v5, 0  ;;  %s1093_s12 = smov 72   ;;  %s1094_s13 = smov 88  }
  0x24   : > { %s1095_s14 = smov 112   ;;  %s1096_s15 = smov 64  }
  0x25   : > { %v1227_v3 = vld [vmem:[#allocation2] sm:$0xff]  ;;  %p867_p0 = scmp.ge.s32.totalorder %s1071_s21, 1 }
  0x26   : > { %v241_v4 = vpack.c.bf16 %v1227_v3, %v1227_v3  ;;  %292 = vmatpush.bf16.msra.mxu0 %v1225_v2 }
  0x29   : > { %831 = vmatmul.msk.bf16.vlgmr.msra.gmra.mxu0 %vm281_vm1, %v241_v4 }
  0xa6   : > { %v294_v7 = vpop.f32.mrf.mxu0 }
  0xa7   : > { %v295_v8 = vadd.f32 %v294_v7, %v268_v6 }
  0xa9   : > { %v298_v9 = vpack.c.bf16 %v295_v8, %v295_v8 }
  0xab   : > { %v300_v10 = vunpack.c.l.b16 %v298_v9 }
  0xad   : > { %v1240_v11 = vpack.c.b16 %v300_v10, %v300_v10 }
  0xae   : > { %v296_v12 = vpop.f32.mrf.mxu0 }
  0xaf   : > { %473 = vrot.lane.b32.xlu2 %v1240_v11, %s1089_s16  ;;  %359 = vrot.lane.b32.xlu1 %v1240_v11, %s1090_s27  ;;  %s1097_s16 = smov 40   ;;  %s1098_s27 = smov 56  }
  0xb0   : > { %302 = vrot.lane.b32.xlu0 %v1240_v11, %s1091_s7  ;;  %s1099_s7 = smov 48  }
  0xb7   : > { %418 = vrot.lane.b32.xlu2 %v1240_v11, %s1092_s8  ;;  %475 = vrot.lane.b32.xlu1 %v1240_v11, %s1093_s12  ;;  %s1100_s8 = smov 32   ;;  %s1101_s12 = smov 8  }
  0xb8   : > { %361 = vrot.lane.b32.xlu0 %v1240_v11, %s1094_s13  ;;  %s1102_s13 = smov 16  }
  0xc0   : > { %416 = vrot.lane.b32.xlu0 %v1240_v11, %s1095_s14  ;;  %s1103_s14 = smov 24  }
 0x109   : > { %v474_v13 = vpop.permute.xlu2 %473 }
 0x111   : > { %v419_v14 = vpop.permute.xlu2 %418 }
 0x112   : > { %v424_v15 = vsel %vm304_vm2, %v419_v14, 0 }
 0x113   : > { %433 = vmatpush.bf16.xpose.msrb.mxu0 %v424_v15 }
 0x121   : > { %v360_v16 = vpop.permute.xlu1 %359 }
 0x122   : > { %v303_v17 = vpop.permute.xlu0 %302 }
 0x123   : > { %v309_v18 = vsel %vm304_vm2, %v303_v17, 0 }
 0x124   : > { %318 = vmatpush.bf16.xpose.msra.mxu1 %v309_v18 }
 0x129   : > { %v476_v19 = vpop.permute.xlu1 %475 }
 0x12a   : > { %v362_v20 = vpop.permute.xlu0 %361  ;;  %v481_v21 = vsel %vm304_vm2, %v476_v19, 0 }
 0x12b   : > { %832 = vmatmul.msk.bf16.vlgmr.msra.gmra.mxu1 %vm304_vm2, %v298_v9  ;;  %v367_v22 = vsel %vm304_vm2, %v362_v20, 0 }
 0x12c   : > { %376 = vmatpush.bf16.xpose.msra.mxu3 %v367_v22 }
 0x132   : > { %v417_v23 = vpop.permute.xlu0 %416 }
 0x133   : > { %834 = vmatmul.msk.bf16.vlgmr.msra.gmra.mxu3 %vm304_vm2, %v360_v16  ;;  %836 = vmatmul.msk.bf16.vlgmr.msrb.gmra.mxu0 %vm304_vm2, %v417_v23 }
 0x134   : > { %490 = vmatpush.bf16.xpose.msrb.mxu3 %v481_v21 }
 0x143   : > { %838 = vmatmul.msk.bf16.vlgmr.msrb.gmra.mxu3 %vm304_vm2, %v474_v13 }
 0x1a8   : > { %v320_v24 = vpop.f32.mrf.mxu1 }
 0x1a9   : > { %v324_v25 = vmul.f32 0.35355338, %v320_v24 }
 0x1ab   : > { %v325_v26 = vsel %vm304_vm2, %v324_v25, -inf }
 0x1ac   : > { %326 = vmax.xlane.f32.xlu1 %v325_v26 }
 0x1b0   : > { %v322_v27 = vpop.f32.mrf.mxu1  ;;  %v435_v28 = vpop.f32.mrf.mxu0 }
 0x1b1   : > { %v439_v33 = vmul.f32 0.35355338, %v435_v28 }
 0x1b3   : > { %v440_v35 = vsel %vm304_vm2, %v439_v33, -inf }
 0x1b6   : > { %v378_v29 = vpop.f32.mrf.mxu3 }
 0x1b7   : > { %v382_v30 = vmul.f32 0.35355338, %v378_v29 }
 0x1b8   : > { %v437_v31 = vpop.f32.mrf.mxu0 }
 0x1b9   : > { %v383_v32 = vsel %vm304_vm2, %v382_v30, -inf }
 0x1ba   : > { %384 = vmax.xlane.f32.xlu2 %v383_v32 }
 0x1be   : > { %v380_v34 = vpop.f32.mrf.mxu3 }
 0x1c2   : > { %441 = vmax.xlane.f32.xlu2 %v440_v35 }
 0x1c6   : > { %v492_v36 = vpop.f32.mrf.mxu3 }
 0x1c7   : > { %v496_v37 = vmul.f32 0.35355338, %v492_v36 }
 0x1c9   : > { %v497_v38 = vsel %vm304_vm2, %v496_v37, -inf }
 0x1ca   : > { %498 = vmax.xlane.f32.xlu0 %v497_v38 }
 0x1ce   : > { %v494_v39 = vpop.f32.mrf.mxu3 }
 0x1da   : > { %337 = vrot.lane.b32.xlu2 %v1240_v11, %s1096_s15 }
 0x1e2   : > { %509 = vrot.lane.b32.xlu2 %v1240_v11, %s1097_s16 }
 0x21f   : > { %v327_v40 = vpop.xlane.xlu1 %326 }
 0x220   : > { %v328_v41 = vsub.f32 %v324_v25, %v327_v40  ;;  %v548_v40 = vperm.slane %v1237_v5, 2 }
 0x222   : > { %v329_v42 = vmul.f32 1.442695, %v328_v41 }
 0x224   : > { %971 = vpow2.f32 %v329_v42 }
 0x22a   : > { %v972_v43 = vpop.eup %971 }
 0x22b   : > { %v331_v44 = vsel %vm304_vm2, %v972_v43, 0.0 }
 0x22c   : > { %332 = vadd.xlane.f32.xlu1 %v331_v44  ;;  %v1104_v44 = vmov 32.0  }
 0x22d   : > { %v385_v45 = vpop.xlane.xlu2 %384 }
 0x22e   : > { %v386_v48 = vsub.f32 %v382_v30, %v385_v45 }
 0x230   : > { %v387_v50 = vmul.f32 1.442695, %v386_v48 }
 0x235   : > { %v442_v46 = vpop.xlane.xlu2 %441 }
 0x236   : > { %v443_v47 = vsub.f32 %v439_v33, %v442_v46 }
 0x238   : > { %v444_v49 = vmul.f32 1.442695, %v443_v47 }
 0x23a   : > { %973 = vpow2.f32 %v444_v49 }
 0x23b   : > { %975 = vpow2.f32 %v387_v50 }
 0x23d   : > { %v338_v51 = vpop.permute.xlu2 %337  ;;  %v499_v52 = vpop.xlane.xlu0 %498 }
 0x23e   : > { %v344_v53 = vsel %vm342_vm3, %v338_v51, 0  ;;  %v500_v55 = vsub.f32 %v496_v37, %v499_v52 }
 0x23f   : > { %353 = vmatpush.bf16.msra.mxu2 %v344_v53 }
 0x240   : > { %v974_v54 = vpop.eup %973  ;;  %v501_v57 = vmul.f32 1.442695, %v500_v55 }
 0x241   : > { %v446_v56 = vsel %vm304_vm2, %v974_v54, 0.0  ;;  %v976_v58 = vpop.eup %975 }
 0x242   : > { %447 = vadd.xlane.f32.xlu0 %v446_v56  ;;  %977 = vpow2.f32 %v501_v57  ;;  %v389_v59 = vsel %vm304_vm2, %v976_v58, 0.0 }
 0x245   : > { %395 = vrot.lane.b32.xlu1 %v1240_v11, %s1098_s27  ;;  %v510_v7 = vpop.permute.xlu2 %509  ;;  %s250_s27 = scalar_lea.vmem %s1363_s2, %s873_s26 }
 0x246   : > { %v515_v10 = vsel %vm342_vm3, %v510_v7, 0  ;;  %v878_v56 = vld [vmem:[%s250_s27 + $0x8] sm:$0xff]  ;;  %v877_v57 = vld [vmem:[%s250_s27] sm:$0xff] }
 0x248   : > { %v978_v60 = vpop.eup %977 }
 0x249   : > { %v503_v61 = vsel %vm304_vm2, %v978_v60, 0.0 }
 0x24a   : > { %390 = vadd.xlane.f32.xlu0 %v389_v59 }
 0x24d   : > { %551 = vrot.lane.b32.xlu1 %v1222_v1, %s1100_s8 }
 0x252   : > { %504 = vadd.xlane.f32.xlu0 %v503_v61 }
 0x266   : > { %452 = vrot.lane.b32.xlu0 %v1240_v11, %s1099_s7  ;;  %s879_s7 = sshll.u32 %s1071_s21, 5 }
 0x29f   : > { %v333_v62 = vpop.xlane.xlu1 %332 }
 0x2a0   : > { %979 = vrcp.f32 %v333_v62 }
 0x2a6   : > { %v980_v63 = vpop.eup %979 }
 0x2a7   : > { %v335_v0 = vmul.f32 %v980_v63, %v972_v43 }
 0x2a9   : > { %v336_v4 = vpack.c.bf16 %v335_v0, %v335_v0 }
 0x2ab   : > { %833 = vmatmul.msk.bf16.vlgmr.msra.gmra.mxu2 %vm304_vm2, %v336_v4 }
 0x2b5   : > { %v448_v6 = vpop.xlane.xlu0 %447 }
 0x2b7   : > { %v396_v8 = vpop.permute.xlu1 %395 }
 0x2b8   : > { %v401_v9 = vsel %vm342_vm3, %v396_v8, 0 }
 0x2b9   : > { %410 = vmatpush.bf16.msrb.mxu2 %v401_v9  ;;  %v600_v9 = vperm.slane %v1237_v5, 3 }
 0x2bd   : > { %524 = vmatpush.bf16.msra.mxu2 %v515_v10  ;;  %v391_v12 = vpop.xlane.xlu0 %390 }
 0x2be   : > { %981 = vrcp.f32 %v391_v12  ;;  %v602_v12 = vperm.slane %v1237_v5, 4 }
 0x2bf   : > { %v552_v31 = vpop.permute.xlu1 %551 }
 0x2c0   : > { %564 = vmatpush.bf16.msra.mxu0 %v552_v31 }
 0x2c4   : > { %v982_v13 = vpop.eup %981 }
 0x2c5   : > { %v393_v11 = vmul.f32 %v982_v13, %v976_v58  ;;  %v505_v14 = vpop.xlane.xlu0 %504 }
 0x2c6   : > { %983 = vrcp.f32 %v505_v14 }
 0x2c7   : > { %v394_v15 = vpack.c.bf16 %v393_v11, %v393_v11  ;;  %985 = vrcp.f32 %v448_v6 }
 0x2c8   : > { %987 = vrcp.f32 %v1104_v44 }
 0x2c9   : > { %835 = vmatmul.msk.bf16.vlgmr.msrb.gmra.mxu2 %vm304_vm2, %v394_v15 }
 0x2cc   : > { %v984_v16 = vpop.eup %983 }
 0x2cd   : > { %v507_v17 = vmul.f32 %v984_v16, %v978_v60  ;;  %v986_v18 = vpop.eup %985 }
 0x2ce   : > { %v450_v19 = vmul.f32 %v986_v18, %v974_v54  ;;  %v988_v45 = vpop.eup %987 }
 0x2cf   : > { %v508_v20 = vpack.c.bf16 %v507_v17, %v507_v17  ;;  %v575_v46 = vmul.f32 32.0, %v988_v45  ;;  %vm579_vm6 = vweird.f32 %v988_v45 }
 0x2d0   : > { %v451_v23 = vpack.c.bf16 %v450_v19, %v450_v19  ;;  %v606_v19 = vperm.slane %v1237_v5, 1 }
 0x2d1   : > { %v576_v47 = vsub.f32 1.0, %v575_v46 }
 0x2d3   : > { %v577_v48 = vmul.f32 %v988_v45, %v576_v47 }
 0x2d5   : > { %v578_v49 = vadd.f32 %v988_v45, %v577_v48 }
 0x2d7   : > { %v1283_v50 = vsel %vm579_vm6, %v988_v45, %v578_v49 }
 0x2d8   : > { %v453_v21 = vpop.permute.xlu0 %452 }
 0x2d9   : > { %839 = vmatmul.msk.bf16.vlgmr.msra.gmra.mxu2 %vm304_vm2, %v508_v20  ;;  %v458_v22 = vsel %vm342_vm3, %v453_v21, 0 }
 0x2da   : > { %467 = vmatpush.bf16.msrb.mxu1 %v458_v22 }
 0x2dd   : > { %837 = vmatmul.msk.bf16.vlgmr.msrb.gmra.mxu1 %vm304_vm2, %v451_v23 }
 0x2de   : > { %628 = vmatpush.bf16.msra.mxu1 %v878_v56 }
 0x2e2   : > { %629 = vmatpush.bf16.msra.mxu1 %v877_v57 }
 0x32e   : > { %v355_v24 = vpop.f32.mrf.mxu2 }
 0x336   : > { %v357_v25 = vpop.f32.mrf.mxu2 }
 0x337   : > { %v637_v25 = vperm.slane %v1237_v5, 5 }
 0x34c   : > { %v412_v26 = vpop.f32.mrf.mxu2 }
 0x34d   : > { %531 = vrot.lane.b32.xlu2 %v412_v26, %s1101_s12 }
 0x354   : > { %v414_v1 = vpop.f32.mrf.mxu2 }
 0x35a   : > { %v469_v27 = vpop.f32.mrf.mxu1 }
 0x35b   : > { %535 = vrot.lane.b32.xlu1 %v469_v27, %s1102_s13  ;;  %s257_s13 = scalar_lea.vmem %s1364_s3, %s879_s7 }
 0x35c   : > { %v526_v28 = vpop.f32.mrf.mxu2  ;;  %v883_v60 = vld [vmem:[%s257_s13 + $0x18] sm:$0xff]  ;;  %v882_v62 = vld [vmem:[%s257_s13 + $0x10] sm:$0xff]  ;;  %v881_v17 = vld [vmem:[%s257_s13 + $0x8] sm:$0xff] }
 0x35d   : > { %539 = vrot.lane.b32.xlu2 %v526_v28, %s1103_s14  ;;  %670 = vmatpush.bf16.msra.mxu3 %v883_v60  ;;  %v880_v18 = vld [vmem:[%s257_s13] sm:$0xff] }
 0x361   : > { %671 = vmatpush.bf16.msra.mxu3 %v882_v62 }
 0x362   : > { %v471_v29 = vpop.f32.mrf.mxu1 }
 0x363   : > { %549 = vrot.lane.b32.xlu1 %v1225_v2, %s1100_s8 }
 0x364   : > { %v528_v30 = vpop.f32.mrf.mxu2 }
 0x365   : > { %672 = vmatpush.bf16.msra.mxu3 %v881_v17 }
 0x369   : > { %673 = vmatpush.bf16.msra.mxu3 %v880_v18 }
 0x3a7   : > { %v532_v32 = vpop.permute.xlu2 %531 }
 0x3a8   : > { %v542_v34 = vsel %vm304_vm2, %v355_v24, %v532_v32 }
 0x3b7   : > { %v540_v36 = vpop.permute.xlu2 %539 }
 0x3cd   : > { %v536_v33 = vpop.permute.xlu1 %535 }
 0x3ce   : > { %v544_v35 = vsel %vm543_vm4, %v542_v34, %v536_v33 }
 0x3cf   : > { %v546_v37 = vsel %vm545_vm5, %v544_v35, %v540_v36 }
 0x3d0   : > { %v547_v39 = vpack.c.bf16 %v546_v37, %v546_v37 }
 0x3d5   : > { %v550_v38 = vpop.permute.xlu1 %549 }
 0x3d6   : > { %565 = vmatpush.bf16.msra.mxu0 %v550_v38 }
 0x3d9   : > { %840 = vmatmul.msk.bf16.vlgmr.msra.gmra.mxu0 %vm281_vm1, %v547_v39 }
 0x456   : > { %v567_v2 = vpop.f32.mrf.mxu0 }
 0x457   : > { %v568_v41 = vadd.f32 %v567_v2, %v548_v40 }
 0x459   : > { %v571_v42 = vsel %vm281_vm1, %v568_v41, 0.0 }
 0x45a   : > { %572 = vadd.xlane.f32.xlu0 %v571_v42 }
 0x45e   : > { %v569_v43 = vpop.f32.mrf.mxu0 }
 0x45f   : > { %v703_v43 = vperm.slane %v1237_v5, 7 }
 0x4cd   : > { %v573_v51 = vpop.xlane.xlu0 %572 }
 0x4ce   : > { %v581_v52 = vmul.f32 %v1283_v50, %v573_v51 }
 0x4d0   : > { %v582_v53 = vsub.f32 %v568_v41, %v581_v52  ;;  %v701_v41 = vperm.slane %v1237_v5, 6 }
 0x4d2   : > { %v583_v54 = vmul.f32 %v582_v53, %v582_v53 }
 0x4d4   : > { %v584_v55 = vsel %vm281_vm1, %v583_v54, 0.0 }
 0x4d5   : > { %585 = vadd.xlane.f32.xlu2 %v584_v55 }
 0x548   : > { %v586_v58 = vpop.xlane.xlu2 %585 }
 0x549   : > { %v587_v59 = vmul.f32 %v586_v58, %v1283_v50 }
 0x54b   : > { %v588_v61 = vadd.f32 1e-05, %v587_v59 }
 0x54d   : > { %989 = vrsqrt.f32 %v588_v61  ;;  %vm595_vm8 = vweird.f32 %v588_v61 }
 0x553   : > { %v990_v63 = vpop.eup %989 }
 0x554   : > { %v590_v0 = vmul.f32 %v990_v63, %v588_v61  ;;  %vm596_vm7 = vweird.f32 %v990_v63 }
 0x555   : > { %vm597_vm9 = vmor %vm595_vm8, %vm596_vm7 }
 0x556   : > { %v591_v4 = vmul.f32 %v990_v63, %v590_v0 }
 0x558   : > { %v592_v6 = vmul.f32 0.5, %v591_v4 }
 0x55a   : > { %v593_v7 = vsub.f32 1.5, %v592_v6 }
 0x55c   : > { %v594_v8 = vmul.f32 %v990_v63, %v593_v7 }
 0x55e   : > { %v598_v10 = vsel %vm597_vm9, %v990_v63, %v594_v8 }
 0x55f   : > { %v599_v13 = vmul.f32 %v598_v10, %v582_v53 }
 0x561   : > { %v601_v11 = vmul.f32 %v600_v9, %v599_v13 }
 0x563   : > { %v603_v14 = vadd.f32 %v602_v12, %v601_v11 }
 0x565   : > { %v604_v15 = vadd.f32 %v603_v14, %v1227_v3 }
 0x567   : > { %v605_v16 = vpack.c.bf16 %v604_v15, %v604_v15 }
 0x569   : > { %849 = vmatmul.msk.bf16.vlgmr.msra.gmra.mxu1 %vm281_vm1, %v605_v16 }
 0x5e6   : > { %v631_v20 = vpop.f32.mrf.mxu1 }
 0x5e7   : > { %v632_v21 = vadd.f32 %v631_v20, %v606_v19 }
 0x5e9   : > { %v635_v22 = vmax.f32 %v632_v21, 0.0 }
 0x5eb   : > { %v636_v23 = vpack.c.bf16 %v635_v22, %v635_v22 }
 0x5ed   : > { %866 = vmatmul.msk.bf16.vlgmr.msra.gmra.mxu3 %vm662_vm10, %v636_v23 }
 0x5ee   : > { %v633_v24 = vpop.f32.mrf.mxu1 }
 0x670   : > { %v675_v26 = vpop.f32.mrf.mxu3 }
 0x671   : > { %v676_v3 = vadd.f32 %v675_v26, %v637_v25 }
 0x673   : > { %v679_v1 = vsel %vm281_vm1, %v676_v3, 0.0 }
 0x674   : > { %680 = vadd.xlane.f32.xlu1 %v679_v1 }
 0x678   : > { %v677_v27 = vpop.f32.mrf.mxu3 }
 0x6e7   : > { %v681_v28 = vpop.xlane.xlu1 %680 }
 0x6e8   : > { %v682_v29 = vmul.f32 %v681_v28, %v1283_v50 }
 0x6ea   : > { %v683_v30 = vsub.f32 %v676_v3, %v682_v29 }
 0x6ec   : > { %v684_v31 = vmul.f32 %v683_v30, %v683_v30 }
 0x6ee   : > { %v685_v32 = vsel %vm281_vm1, %v684_v31, 0.0 }
 0x6ef   : > { %686 = vadd.xlane.f32.xlu0 %v685_v32 }
 0x762   : > { %v687_v33 = vpop.xlane.xlu0 %686 }
 0x763   : > { %v688_v34 = vmul.f32 %v687_v33, %v1283_v50 }
 0x765   : > { %v689_v35 = vadd.f32 1e-05, %v688_v34 }
 0x767   : > { %991 = vrsqrt.f32 %v689_v35  ;;  %vm696_vm12 = vweird.f32 %v689_v35 }
 0x76d   : > { %v992_v36 = vpop.eup %991 }
 0x76e   : > { %v691_v37 = vmul.f32 %v992_v36, %v689_v35  ;;  %vm697_vm11 = vweird.f32 %v992_v36 }
 0x76f   : > { %vm698_vm13 = vmor %vm696_vm12, %vm697_vm11 }
 0x770   : > { %v692_v38 = vmul.f32 %v992_v36, %v691_v37 }
 0x772   : > { %v693_v39 = vmul.f32 0.5, %v692_v38 }
 0x774   : > { %v694_v40 = vsub.f32 1.5, %v693_v39 }
 0x776   : > { %v695_v2 = vmul.f32 %v992_v36, %v694_v40 }
 0x778   : > { %v699_v42 = vsel %vm698_vm13, %v992_v36, %v695_v2 }
 0x779   : > { %v700_v44 = vmul.f32 %v699_v42, %v683_v30 }
 0x77b   : > { %v702_v45 = vmul.f32 %v701_v41, %v700_v44  ;;  %709 = sbr.rel (%p867_p0) target bundleno = 1922 (0x782), region = 48 }
 0x77d   : > { %v704_v46 = vadd.f32 %v703_v43, %v702_v45 }
 0x77f   : > { %v705_v47 = vadd.f32 %v704_v46, %v604_v15 }
 0x781   : > { %710 = vst.msk [vmem:[#allocation2] sm:$0xff] %vm281_vm1, %v705_v47 }
 0x782 PF: > { %p868_p1 = scmp.ne.s32.totalorder %s1071_s21, 1 }
 0x784   : > { %714 = sbr.rel (%p868_p1) target bundleno = 1930 (0x78a), region = 52 }
 0x789   : > { %715 = vst.msk [vmem:[%s227_s17] sm:$0xff] %vm281_vm1, %v705_v47 }
 0x78a PF: > { %s870_s26 = sshll.u32 %s1075_s22, 3  ;;  %s729_s27 = sshll.u32 %s227_s17, 4  ;;  %s730_s27 = int_to_ptr.vmem [resolvable:$true] %s729_s27 }
 0x78b   : > { %s727_s16 = scalar_lea.hbm %s1366_s5, %s870_s26  ;;  %s717_s21 = scalar_lea.sflag [#allocation4], %s225_s10 }
 0x78c   : > { %s731_s7 = sshll.u32 %s727_s16, 4  ;;  %s1013_s0 = scalar_lea.hbm %s1366_s5, 16  ;;  %s732_s7 = int_to_ptr.hbm [resolvable:$true] %s731_s7 }
 0x78d   : > { %s1007_s8 = sshra.s32 %s732_s7, 4  ;;  %s1008_s8 = int_to_ptr.hbm [resolvable:$true] %s1007_s8 }
 0x78e   : > { %s1009_s12 = scalar_lea.hbm %s1008_s8, 8  ;;  %p1014_p6 = scmp.lt.s32.totalorder %s1008_s8, %s1366_s5 }
 0x78f   : > { %p1010_p2 = scmp.ne.s32.totalorder %s1008_s8, %s1009_s12  ;;  %p1015_p7 = scmp.lt.s32.totalorder %s1013_s0, %s1009_s12 }
 0x791   : > { %p1011_p4 = pnand %p1010_p2, %p1184_p3  ;;  %p1016_p8 = por %p1015_p7, %p1014_p6 }
 0x793   : > { %p1012_p5 = pneg %p1011_p4 }
 0x795   : > { %p1017_p10 = pnand %p1016_p8, %p1012_p5 }
 0x797   : > { %1020 = shalt.err (!%p1017_p10)
}
 0x798   : > { %884 = dma.vmem_to_hbm [thread:$0]  (%p1184_p3), %s730_s27, 128, %s732_s7, %s717_s21  }
 0x799 PF: > { %p890_p11 = scmp.ge.s32.totalorder %s1087_s25, 2  ;;  %s743_s10 = sand.u32 1, %s1059_s18  }
 0x79a   : > { %s744_s11 = scalar_lea.sflag [#allocation4], %s743_s10 }
 0x79b   : > { %p887_p12 = pnand %p890_p11, %p1194_p9 }
 0x79d   : > { %p888_p13 = pneg %p887_p12 }
 0x79f   : > { %1054 = dma.done.wait (%p888_p13), %s744_s11, 128  }
 0x7a0   : > { %1056 = vsyncadd (%p888_p13), %s744_s11, 4294967168  ;;  %s18_s25 = sadd.s32 1, %s1087_s25   ;;  %s1371_s18 = smov %s1063_s19 }
 0x7a1   : > { %p15_p0 = scmp.ge.s32.totalorder %s18_s25, 6   ;;  %s1372_s19 = smov %s1067_s20 }
 0x7a2   : > { %s1373_s20 = smov %s1202_s9  ;;  %s1374_s21 = smov %s1079_s23 }
 0x7a3   : > { %s1375_s22 = smov %s1083_s24  ;;  %s1376_s23 = smov %s1379_s28 }
 0x7a4   : > { %s1377_s24 = smov %s1383_s29  ;;  %17 = sbr.rel (!%p15_p0) target bundleno = 7 (0x7), region = 91 }
 0x7a9   :  { %750 = vsyncpa [#allocation4], 1 }
 0x7aa   :  { %752 = vsyncpa [#allocation4 + $0x1], 1 }

</bundles_post_ra>
